<compile_context>
chip_gen: v6e
topology: v6e:2x2x1
jax: 0.10.0
libtpu: 0.0.40
codegen_flags: <defaults>
</compile_context>

<pallas_src>
import jax
import jax.numpy as jnp
from jax import lax
from jax.experimental import pallas as pl
from jax.experimental.pallas import tpu as pltpu


def skipgram_chunk_kernel(f_idx_ref, c_idx_ref, table_t_ref, out_ref):
    # f_idx_ref / c_idx_ref: (1, P) int32 VMEM tiles of focus / context ids.
    # table_t_ref: (D_pad, V_pad) f32 VMEM tile = transposed, zero-padded
    #   embedding table; same block every grid step -> DMA'd once, resident.
    # out_ref: (1, P) f32 lane-dense output block (logsigmoid scores).
    f_idx = f_idx_ref[...]                               # (1, P) int32
    c_idx = c_idx_ref[...]                               # (1, P) int32
    table_t = table_t_ref[...]                           # (D_pad, V_pad) f32

    v_pad = table_t.shape[1]
    p = f_idx.shape[1]

    # One-hot gather in transposed layout: onehot[v, p] = (idx[p] == v).
    # The (1, P) index row broadcasts along sublanes -- no relayout.
    vocab = lax.broadcasted_iota(jnp.int32, (v_pad, p), 0)
    onehot_f = (vocab == f_idx).astype(jnp.float32)      # (V_pad, P)
    onehot_c = (vocab == c_idx).astype(jnp.float32)      # (V_pad, P)

    # (D_pad, V_pad) @ (V_pad, P) -> (D_pad, P) on the MXU: column p holds
    # the embedding of pair p's focus / context word.
    ef_t = jnp.dot(table_t, onehot_f, preferred_element_type=jnp.float32)
    ec_t = jnp.dot(table_t, onehot_c, preferred_element_type=jnp.float32)

    # Per-pair dot product: elementwise multiply (VPU) + sublane reduce over
    # the D axis -> already lane-dense (1, P).  Zero padding of D / V
    # contributes nothing.
    scores = jnp.sum(ef_t * ec_t, axis=0, keepdims=True)  # (1, P) f32

    # Numerically stable logsigmoid(x) = min(x, 0) - log1p(exp(-|x|)),
    # lane-dense (128 pairs per EUP op), stored with an unmasked vst.
    out_ref[...] = (jnp.minimum(scores, 0.0)
                    - jnp.log1p(jnp.exp(-jnp.abs(scores))))


def skipgram_forward(embeddings, focus, context, *, pairs_per_step=128):
    """embeddings: (V, D) f32, focus/context: (B,) int -> (B, 1) f32 log-probs.

    For B == 1 this matches the PyTorch module's (1, 1) output exactly.
    """
    V, D = embeddings.shape
    B = focus.shape[0]

    P = pairs_per_step
    assert P % 128 == 0, "pairs_per_step must be a multiple of the lane width"

    D_pad = pl.cdiv(D, 8) * 8                     # sublane axis of table_t
    V_pad = max(pl.cdiv(V, 128) * 128, 128)       # lane axis of table_t
    B_pad = max(pl.cdiv(B, P) * P, P)

    # Transposed, zero-padded table (D_pad, V_pad).  Padded rows / columns are
    # zero and contribute nothing to the one-hot matmul or the score.
    table_t = jnp.zeros((D_pad, V_pad), jnp.float32)
    table_t = table_t.at[:D, :V].set(embeddings.astype(jnp.float32).T)

    # Clamp indices (nn.Embedding would raise on OOB; we clamp instead) and
    # pad the batch with index 0 -- padded lanes are sliced off below.
    focus = jnp.clip(focus.astype(jnp.int32), 0, V - 1)
    context = jnp.clip(context.astype(jnp.int32), 0, V - 1)
    focus = jnp.pad(focus, (0, B_pad - B)).reshape(1, B_pad)
    context = jnp.pad(context, (0, B_pad - B)).reshape(1, B_pad)

    out = pl.pallas_call(
        skipgram_chunk_kernel,
        out_shape=jax.ShapeDtypeStruct((1, B_pad), jnp.float32),
        grid_spec=pltpu.PrefetchScalarGridSpec(
            num_scalar_prefetch=0,
            grid=(B_pad // P,),
            in_specs=[
                # Per-chunk lane-dense index rows.
                pl.BlockSpec((1, P), lambda i: (0, i)),
                pl.BlockSpec((1, P), lambda i: (0, i)),
                # Whole table, same block every step -> one DMA, resident.
                pl.BlockSpec((D_pad, V_pad), lambda i: (0, 0)),
            ],
            # Each step writes its own 128-wide output block (unmasked vst).
            out_specs=pl.BlockSpec((1, P), lambda i: (0, i)),
        ),
        compiler_params=pltpu.CompilerParams(
            dimension_semantics=("parallel",),    # disjoint output blocks
        ),
    )(focus, context, table_t)

    return out[:, :B].reshape(B, 1)


if __name__ == "__main__":
    # Small, deterministic synthetic setup (the module's __init__ only defines
    # the (vocab_size, embd_size) embedding matrix; embd_size = 100).
    vocab_size = 32
    embd_size = 100

    key = jax.random.PRNGKey(0)
    k_emb, k_f, k_c = jax.random.split(key, 3)
    emb = jax.random.normal(k_emb, (vocab_size, embd_size), dtype=jnp.float32)

    B = 8
    focus = jax.random.randint(k_f, (B,), 0, vocab_size, dtype=jnp.int32)
    context = jax.random.randint(k_c, (B,), 0, vocab_size, dtype=jnp.int32)

    log_probs = jax.block_until_ready(skipgram_forward(emb, focus, context))

    # Reference in plain JAX (same math as the PyTorch forward, per pair).
    scores = jnp.sum(emb[focus] * emb[context], axis=-1, keepdims=True)  # (B,1)
    ref = jax.nn.log_sigmoid(scores)
    assert log_probs.shape == (B, 1)
    assert jnp.allclose(log_probs, ref, atol=1e-5, rtol=1e-5)

    # Single-pair case: exact shape/semantics match with the PyTorch module.
    lp1 = jax.block_until_ready(skipgram_forward(emb, focus[:1], context[:1]))
    ref1 = jax.nn.log_sigmoid(emb[focus[0]] @ emb[context[0]]).reshape(1, 1)
    assert lp1.shape == (1, 1)
    assert jnp.allclose(lp1, ref1, atol=1e-5, rtol=1e-5)

    print("KERNEL_OK")
</pallas_src>

<mosaic_0001>
module attributes {stable_mosaic.version = 11 : i64} {
  func.func @skipgram_chunk_kernel(%arg0: i32, %arg1: memref<1x128xi32, #tpu.memory_space<vmem>>, %arg2: memref<1x128xi32, #tpu.memory_space<vmem>>, %arg3: memref<104x128xf32, #tpu.memory_space<vmem>>, %arg4: memref<1x128xf32, #tpu.memory_space<vmem>>) attributes {dimension_semantics = [#tpu.dimension_semantics<parallel>], iteration_bounds = array<i64: 1>, scalar_prefetch = 0 : i64, scratch_operands = 0 : i64, tpu.core_type = #tpu.core_type<tc>, window_params = [{transform_indices = @transform_0, window_bounds = array<i64: 1, 128>}, {transform_indices = @transform_1, window_bounds = array<i64: 1, 128>}, {pipeline_mode = #tpu.pipeline_mode<synchronous>, transform_indices = @transform_2, window_bounds = array<i64: 104, 128>}, {transform_indices = @transform_3, window_bounds = array<i64: 1, 128>}]} {
    %c0 = arith.constant 0 : index
    %c0_0 = arith.constant 0 : index
    %0 = vector.load %arg1[%c0, %c0_0] : memref<1x128xi32, #tpu.memory_space<vmem>>, vector<1x128xi32>
    %c0_1 = arith.constant 0 : index
    %c0_2 = arith.constant 0 : index
    %1 = vector.load %arg2[%c0_1, %c0_2] : memref<1x128xi32, #tpu.memory_space<vmem>>, vector<1x128xi32>
    %c0_3 = arith.constant 0 : index
    %c0_4 = arith.constant 0 : index
    %2 = vector.load %arg3[%c0_3, %c0_4] : memref<104x128xf32, #tpu.memory_space<vmem>>, vector<104x128xf32>
    %3 = tpu.iota {dimensions = array<i32: 0>} : vector<128x128xi32>
    %4 = vector.broadcast %0 : vector<1x128xi32> to vector<128x128xi32>
    %5 = arith.cmpi eq, %3, %4 : vector<128x128xi32>
    %6 = arith.extui %5 : vector<128x128xi1> to vector<128x128xi32>
    %7 = arith.sitofp %6 : vector<128x128xi32> to vector<128x128xf32>
    %8 = vector.broadcast %1 : vector<1x128xi32> to vector<128x128xi32>
    %9 = arith.cmpi eq, %3, %8 : vector<128x128xi32>
    %10 = arith.extui %9 : vector<128x128xi1> to vector<128x128xi32>
    %11 = arith.sitofp %10 : vector<128x128xi32> to vector<128x128xf32>
    %cst = arith.constant dense<0.000000e+00> : vector<104x128xf32>
    %12 = tpu.matmul %2, %7, %cst {dimension_numbers = #tpu.dot_dimension_numbers<[1], [0], [0], [1], [0, 0, 1, 1], [], []>} : vector<104x128xf32>, vector<128x128xf32>, vector<104x128xf32> -> vector<104x128xf32>
    %cst_5 = arith.constant dense<0.000000e+00> : vector<104x128xf32>
    %13 = tpu.matmul %2, %11, %cst_5 {dimension_numbers = #tpu.dot_dimension_numbers<[1], [0], [0], [1], [0, 0, 1, 1], [], []>} : vector<104x128xf32>, vector<128x128xf32>, vector<104x128xf32> -> vector<104x128xf32>
    %14 = arith.mulf %12, %13 : vector<104x128xf32>
    %cst_6 = arith.constant dense<0.000000e+00> : vector<128xf32>
    %15 = vector.multi_reduction <add>, %14, %cst_6 [0] : vector<104x128xf32> to vector<128xf32>
    %16 = vector.shape_cast %15 : vector<128xf32> to vector<1x128xf32>
    %cst_7 = arith.constant 0.000000e+00 : f32
    %17 = vector.broadcast %cst_7 : f32 to vector<1x128xf32>
    %18 = arith.minimumf %16, %17 : vector<1x128xf32>
    %19 = math.absf %16 : vector<1x128xf32>
    %cst_8 = arith.constant 0.000000e+00 : f32
    %20 = vector.broadcast %cst_8 : f32 to vector<1x128xf32>
    %21 = arith.subf %20, %19 : vector<1x128xf32>
    %22 = math.exp %21 : vector<1x128xf32>
    %23 = math.log1p %22 : vector<1x128xf32>
    %24 = arith.subf %18, %23 : vector<1x128xf32>
    %c0_9 = arith.constant 0 : index
    %c0_10 = arith.constant 0 : index
    %25 = vector.load %arg4[%c0_9, %c0_10] : memref<1x128xf32, #tpu.memory_space<vmem>>, vector<1x128xf32>
    tpu.vector_store %arg4[%c0_9, %c0_10], %24 {strides = array<i32>} : memref<1x128xf32, #tpu.memory_space<vmem>>, vector<1x128xf32>,
    return
  }
  func.func @transform_0(%arg0: i32) -> (i32, i32) {
    %c0_i32 = arith.constant 0 : i32
    %c0_i32_0 = arith.constant 0 : i32
    return %c0_i32, %arg0 : i32, i32
  }
  func.func @transform_1(%arg0: i32) -> (i32, i32) {
    %c0_i32 = arith.constant 0 : i32
    %c0_i32_0 = arith.constant 0 : i32
    return %c0_i32, %arg0 : i32, i32
  }
  func.func @transform_2(%arg0: i32) -> (i32, i32) {
    %c0_i32 = arith.constant 0 : i32
    %c0_i32_0 = arith.constant 0 : i32
    %c0_i32_1 = arith.constant 0 : i32
    return %c0_i32, %c0_i32_0 : i32, i32
  }
  func.func @transform_3(%arg0: i32) -> (i32, i32) {
    %c0_i32 = arith.constant 0 : i32
    %c0_i32_0 = arith.constant 0 : i32
    return %c0_i32, %arg0 : i32, i32
  }
}

</mosaic_0001>

<bundles_post_ra>
// kernel: tpu_custom_call.1
= control target key start
LH: loop header
LB: loop body
LE: loop exit
PB: predicated region body
PF: predicated region fallthrough
CT: control target
= control target key end

     0   :  { %8 = vsyncpa [#allocation3], 0  ;;  %s1055_s0 = inlined_call_operand.hbm [shape: s32[1,128], index: 0, kind: input, shape index: {}]   ;;  %s1056_s1 = inlined_call_operand.vmem [shape: s32[1,128], index: 1, kind: input, shape index: {}]   ;;  %s1057_s2 = inlined_call_operand.hbm [shape: f32[104,128], index: 2, kind: input, shape index: {}]   ;;  %s1058_s3 = inlined_call_operand.hbm [shape: f32[1,128], index: 3, kind: output, shape index: {}]  }
   0x1   :  { %9 = vsyncpa [#allocation6], 0 }
   0x2   :  { %10 = vsyncpa [#allocation4], 0  ;;  %s844_s12 = smov [#allocation2]   ;;  %s845_s14 = smov [#allocation5]  }
   0x3   :  { %s17_s13 = sshll.u32 %s844_s12, 4  ;;  %s28_s15 = sshll.u32 %s845_s14, 4  ;;  %s18_s13 = int_to_ptr.vmem [resolvable:$true] %s17_s13  ;;  %s29_s15 = int_to_ptr.vmem [resolvable:$true] %s28_s15 }
   0x4   :  { %s786_s16 = scalar_lea.vmem %s18_s13, 16  ;;  %s790_s17 = scalar_lea.vmem %s18_s13, 32 }
   0x5   :  { %p787_p0 = scmp.ne.s32.totalorder %s18_s13, %s786_s16  ;;  %p791_p1 = scmp.lt.s32.totalorder %s18_s13, %s18_s13 }
   0x6   :  { %p792_p2 = scmp.lt.s32.totalorder %s790_s17, %s786_s16 }
   0x8   :  { %p793_p3 = por %p792_p2, %p791_p1 }
   0xa   :  { %p794_p4 = pnand %p793_p3, %p787_p0 }
   0xc   :  { %797 = shalt.err (!%p794_p4)
}
   0xd   :  { %20 = dma.hbm_to_vmem [thread:$0]  %s1055_s0, 16, %s18_s13, [#allocation3]  }
   0xe   :  { %s806_s20 = scalar_lea.vmem %s29_s15, 1664  ;;  %p811_p6 = scmp.lt.s32.totalorder %s29_s15, %s29_s15 }
   0xf   :  { %p807_p5 = scmp.ne.s32.totalorder %s29_s15, %s806_s20  ;;  %p812_p7 = scmp.lt.s32.totalorder %s806_s20, %s806_s20 }
  0x11   :  { %p813_p8 = por %p812_p7, %p811_p6 }
  0x13   :  { %p814_p9 = pnand %p813_p8, %p807_p5 }
  0x15   :  { %817 = shalt.err (!%p814_p9)
}
  0x16   :  { %s846_s21 = smov 128   ;;  %s847_s22 = smov 8  }
  0x17   :  { %34 = dma.hbm_to_vmem [thread:$0]  %s1057_s2, 1664, %s29_s15, [#allocation6], %s846_s21, %s846_s21, %s847_s22  }
  0x18   :  { %838 = dma.done.wait [#allocation3], 16  }
  0x19   :  { %839 = vsyncadd [#allocation3], 4294967280 }
  0x1a   :  { %840 = dma.done.wait [#allocation6], 1664  }
  0x1b   :  { %841 = vsyncadd [#allocation6], 4294965632  ;;  %v56_v0 = vlaneseq  ;;  %v848_v1 = vmov 0.0   ;;  %vm849_vm0 = vmmov 0   ;;  %v889_v6 = vld [vmem:[#allocation2] ss:$0 sm:$0xff] }
  0x1c   :  { %624 = vmatprep.subr.mxu0 %v848_v1  ;;  %695 = vmatprep.subr.mxu1 %v848_v1  ;;  %v894_v7 = vld [vmem:[%s1056_s1] ss:$0 sm:$0xff]  ;;  %v850_v9 = vmov 1.0   ;;  %v43_v21 = vld [vmem:[#allocation5] sm:$0xff]  ;;  %v44_v22 = vld [vmem:[#allocation5 + $0x8] sm:$0xff]  ;;  %s851_s1 = smov [#allocation7]  }
  0x1d   :  { %v880_v2 = vshrl.u32 %v56_v0, 7  ;;  %656 = vmatprep.mubr.msk.f32.mxu0 %vm849_vm0, %v848_v1  ;;  %727 = vmatprep.mubr.msk.f32.mxu1 %vm849_vm0, %v848_v1  ;;  %v45_v23 = vld [vmem:[#allocation5 + $0x10] sm:$0xff]  ;;  %v46_v24 = vld [vmem:[#allocation5 + $0x18] sm:$0xff]  ;;  %v47_v25 = vld [vmem:[#allocation5 + $0x20] sm:$0xff]  ;;  %s490_s25 = sshll.u32 %s851_s1, 4  ;;  %s491_s25 = int_to_ptr.vmem [resolvable:$true] %s490_s25 }
  0x1e   :  { %v48_v26 = vld [vmem:[#allocation5 + $0x28] sm:$0xff]  ;;  %v49_v27 = vld [vmem:[#allocation5 + $0x30] sm:$0xff]  ;;  %v50_v28 = vld [vmem:[#allocation5 + $0x38] sm:$0xff]  ;;  %s818_s26 = scalar_lea.vmem %s491_s25, 16  ;;  %s822_s27 = scalar_lea.vmem %s491_s25, 32 }
  0x1f   :  { %v72_v3 = vadd.s32 120, %v880_v2  ;;  %v71_v4 = vadd.s32 112, %v880_v2  ;;  %v70_v5 = vadd.s32 104, %v880_v2  ;;  %v69_v8 = vadd.s32 96, %v880_v2  ;;  %v51_v29 = vld [vmem:[#allocation5 + $0x40] sm:$0xff]  ;;  %v52_v30 = vld [vmem:[#allocation5 + $0x48] sm:$0xff]  ;;  %p819_p10 = scmp.ne.s32.totalorder %s491_s25, %s818_s26  ;;  %p823_p11 = scmp.lt.s32.totalorder %s491_s25, %s491_s25 }
  0x20   :  { %v68_v10 = vadd.s32 88, %v880_v2  ;;  %v67_v11 = vadd.s32 80, %v880_v2  ;;  %v66_v12 = vadd.s32 72, %v880_v2  ;;  %v65_v13 = vadd.s32 64, %v880_v2  ;;  %v53_v31 = vld [vmem:[#allocation5 + $0x50] sm:$0xff]  ;;  %v54_v32 = vld [vmem:[#allocation5 + $0x58] sm:$0xff]  ;;  %p824_p12 = scmp.lt.s32.totalorder %s822_s27, %s818_s26 }
  0x21   :  { %vm92_vm1 = vcmp.eq.s32.totalorder %v72_v3, %v889_v6  ;;  %vm144_vm2 = vcmp.eq.s32.totalorder %v72_v3, %v894_v7  ;;  %vm91_vm3 = vcmp.eq.s32.totalorder %v71_v4, %v889_v6  ;;  %vm143_vm4 = vcmp.eq.s32.totalorder %v71_v4, %v894_v7  ;;  %v55_v33 = vld [vmem:[#allocation5 + $0x60] sm:$0xff] }
  0x22   :  { %625 = vmatpush3.msk.msra.mxu0 %vm92_vm1, %v850_v9  ;;  %696 = vmatpush3.msk.msra.mxu1 %vm144_vm2, %v850_v9  ;;  %vm90_vm5 = vcmp.eq.s32.totalorder %v70_v5, %v889_v6  ;;  %vm142_vm6 = vcmp.eq.s32.totalorder %v70_v5, %v894_v7  ;;  %vm89_vm7 = vcmp.eq.s32.totalorder %v69_v8, %v889_v6  ;;  %v64_v14 = vadd.s32 56, %v880_v2  ;;  %p825_p13 = por %p824_p12, %p823_p11 }
  0x23   :  { %626 = vmatprep.subr.mxu0 %v848_v1  ;;  %697 = vmatprep.subr.mxu1 %v848_v1  ;;  %vm141_vm8 = vcmp.eq.s32.totalorder %v69_v8, %v894_v7  ;;  %vm88_vm9 = vcmp.eq.s32.totalorder %v68_v10, %v889_v6  ;;  %vm140_vm10 = vcmp.eq.s32.totalorder %v68_v10, %v894_v7  ;;  %v63_v15 = vadd.s32 48, %v880_v2 }
  0x24   :  { %627 = vmatpush3.msk.msra.mxu0 %vm91_vm3, %v850_v9  ;;  %698 = vmatpush3.msk.msra.mxu1 %vm143_vm4, %v850_v9  ;;  %vm87_vm11 = vcmp.eq.s32.totalorder %v67_v11, %v889_v6  ;;  %vm139_vm12 = vcmp.eq.s32.totalorder %v67_v11, %v894_v7  ;;  %vm86_vm13 = vcmp.eq.s32.totalorder %v66_v12, %v889_v6  ;;  %v62_v16 = vadd.s32 40, %v880_v2  ;;  %p826_p0 = pnand %p825_p13, %p819_p10 }
  0x25   :  { %628 = vmatprep.subr.mxu0 %v848_v1  ;;  %699 = vmatprep.subr.mxu1 %v848_v1  ;;  %vm138_vm14 = vcmp.eq.s32.totalorder %v66_v12, %v894_v7  ;;  %vm85_vm15 = vcmp.eq.s32.totalorder %v65_v13, %v889_v6  ;;  %vm137_vm1 = vcmp.eq.s32.totalorder %v65_v13, %v894_v7  ;;  %v61_v17 = vadd.s32 32, %v880_v2 }
  0x26   :  { %629 = vmatpush3.msk.msra.mxu0 %vm90_vm5, %v850_v9  ;;  %700 = vmatpush3.msk.msra.mxu1 %vm142_vm6, %v850_v9  ;;  %vm84_vm2 = vcmp.eq.s32.totalorder %v64_v14, %v889_v6  ;;  %vm136_vm3 = vcmp.eq.s32.totalorder %v64_v14, %v894_v7  ;;  %vm83_vm4 = vcmp.eq.s32.totalorder %v63_v15, %v889_v6  ;;  %v60_v18 = vadd.s32 24, %v880_v2 }
  0x27   :  { %630 = vmatprep.subr.mxu0 %v848_v1  ;;  %701 = vmatprep.subr.mxu1 %v848_v1  ;;  %vm135_vm5 = vcmp.eq.s32.totalorder %v63_v15, %v894_v7  ;;  %vm82_vm6 = vcmp.eq.s32.totalorder %v62_v16, %v889_v6  ;;  %v59_v19 = vadd.s32 16, %v880_v2  ;;  %v58_v20 = vadd.s32 8, %v880_v2 }
  0x28   :  { %631 = vmatpush3.msk.msra.mxu0 %vm89_vm7, %v850_v9  ;;  %702 = vmatpush3.msk.msra.mxu1 %vm141_vm8, %v850_v9  ;;  %vm134_vm7 = vcmp.eq.s32.totalorder %v62_v16, %v894_v7  ;;  %vm81_vm8 = vcmp.eq.s32.totalorder %v61_v17, %v889_v6 }
  0x29   :  { %632 = vmatprep.subr.mxu0 %v848_v1  ;;  %703 = vmatprep.subr.mxu1 %v848_v1 }
  0x2a   :  { %633 = vmatpush3.msk.msra.mxu0 %vm88_vm9, %v850_v9  ;;  %704 = vmatpush3.msk.msra.mxu1 %vm140_vm10, %v850_v9  ;;  %vm133_vm9 = vcmp.eq.s32.totalorder %v61_v17, %v894_v7  ;;  %vm80_vm10 = vcmp.eq.s32.totalorder %v60_v18, %v889_v6 }
  0x2b   :  { %634 = vmatprep.subr.mxu0 %v848_v1  ;;  %705 = vmatprep.subr.mxu1 %v848_v1 }
  0x2c   :  { %635 = vmatpush3.msk.msra.mxu0 %vm87_vm11, %v850_v9  ;;  %706 = vmatpush3.msk.msra.mxu1 %vm139_vm12, %v850_v9  ;;  %vm132_vm11 = vcmp.eq.s32.totalorder %v60_v18, %v894_v7  ;;  %vm79_vm12 = vcmp.eq.s32.totalorder %v59_v19, %v889_v6 }
  0x2d   :  { %636 = vmatprep.subr.mxu0 %v848_v1  ;;  %707 = vmatprep.subr.mxu1 %v848_v1 }
  0x2e   :  { %637 = vmatpush3.msk.msra.mxu0 %vm86_vm13, %v850_v9  ;;  %708 = vmatpush3.msk.msra.mxu1 %vm138_vm14, %v850_v9  ;;  %vm131_vm13 = vcmp.eq.s32.totalorder %v59_v19, %v894_v7  ;;  %vm78_vm14 = vcmp.eq.s32.totalorder %v58_v20, %v889_v6 }
  0x2f   :  { %638 = vmatprep.subr.mxu0 %v848_v1  ;;  %709 = vmatprep.subr.mxu1 %v848_v1 }
  0x30   :  { %639 = vmatpush3.msk.msra.mxu0 %vm85_vm15, %v850_v9  ;;  %710 = vmatpush3.msk.msra.mxu1 %vm137_vm1, %v850_v9  ;;  %vm130_vm15 = vcmp.eq.s32.totalorder %v58_v20, %v894_v7  ;;  %vm77_vm1 = vcmp.eq.s32.totalorder %v880_v2, %v889_v6 }
  0x31   :  { %640 = vmatprep.subr.mxu0 %v848_v1  ;;  %711 = vmatprep.subr.mxu1 %v848_v1 }
  0x32   :  { %641 = vmatpush3.msk.msra.mxu0 %vm84_vm2, %v850_v9  ;;  %712 = vmatpush3.msk.msra.mxu1 %vm136_vm3, %v850_v9  ;;  %vm129_vm2 = vcmp.eq.s32.totalorder %v880_v2, %v894_v7 }
  0x33   :  { %642 = vmatprep.subr.mxu0 %v848_v1  ;;  %713 = vmatprep.subr.mxu1 %v848_v1 }
  0x34   :  { %643 = vmatpush3.msk.msra.mxu0 %vm83_vm4, %v850_v9  ;;  %714 = vmatpush3.msk.msra.mxu1 %vm135_vm5, %v850_v9 }
  0x35   :  { %644 = vmatprep.subr.mxu0 %v848_v1  ;;  %715 = vmatprep.subr.mxu1 %v848_v1 }
  0x36   :  { %645 = vmatpush3.msk.msra.mxu0 %vm82_vm6, %v850_v9  ;;  %716 = vmatpush3.msk.msra.mxu1 %vm134_vm7, %v850_v9 }
  0x37   :  { %646 = vmatprep.subr.mxu0 %v848_v1  ;;  %717 = vmatprep.subr.mxu1 %v848_v1 }
  0x38   :  { %647 = vmatpush3.msk.msra.mxu0 %vm81_vm8, %v850_v9  ;;  %718 = vmatpush3.msk.msra.mxu1 %vm133_vm9, %v850_v9 }
  0x39   :  { %648 = vmatprep.subr.mxu0 %v848_v1  ;;  %719 = vmatprep.subr.mxu1 %v848_v1 }
  0x3a   :  { %649 = vmatpush3.msk.msra.mxu0 %vm80_vm10, %v850_v9  ;;  %720 = vmatpush3.msk.msra.mxu1 %vm132_vm11, %v850_v9 }
  0x3b   :  { %650 = vmatprep.subr.mxu0 %v848_v1  ;;  %721 = vmatprep.subr.mxu1 %v848_v1 }
  0x3c   :  { %651 = vmatpush3.msk.msra.mxu0 %vm79_vm12, %v850_v9  ;;  %722 = vmatpush3.msk.msra.mxu1 %vm131_vm13, %v850_v9 }
  0x3d   :  { %652 = vmatprep.subr.mxu0 %v848_v1  ;;  %723 = vmatprep.subr.mxu1 %v848_v1 }
  0x3e   :  { %653 = vmatpush3.msk.msra.mxu0 %vm78_vm14, %v850_v9  ;;  %724 = vmatpush3.msk.msra.mxu1 %vm130_vm15, %v850_v9 }
  0x3f   :  { %654 = vmatprep.subr.mxu0 %v848_v1  ;;  %725 = vmatprep.subr.mxu1 %v848_v1 }
  0x40   :  { %655 = vmatpush3.msk.msra.mxu0 %vm77_vm1, %v850_v9  ;;  %726 = vmatpush3.msk.msra.mxu1 %vm129_vm2, %v850_v9 }
  0x41   :  { %657 = vmatmul.mubr.f32.vlgmr.msra.gmra.mxu0 %v43_v21  ;;  %728 = vmatmul.mubr.f32.vlgmr.msra.gmra.mxu1 %v43_v21 }
  0x42   :  { %659 = vmatprep.mubr.msk.f32.mxu0 %vm849_vm0, %v848_v1  ;;  %730 = vmatprep.mubr.msk.f32.mxu1 %vm849_vm0, %v848_v1 }
  0x45   :  { %660 = vmatmul.mubr.f32.gmra.mxu0 %v44_v22  ;;  %731 = vmatmul.mubr.f32.gmra.mxu1 %v44_v22 }
  0x46   :  { %662 = vmatprep.mubr.msk.f32.mxu0 %vm849_vm0, %v848_v1  ;;  %733 = vmatprep.mubr.msk.f32.mxu1 %vm849_vm0, %v848_v1 }
  0x49   :  { %663 = vmatmul.mubr.f32.gmra.mxu0 %v45_v23  ;;  %734 = vmatmul.mubr.f32.gmra.mxu1 %v45_v23 }
  0x4a   :  { %665 = vmatprep.mubr.msk.f32.mxu0 %vm849_vm0, %v848_v1  ;;  %736 = vmatprep.mubr.msk.f32.mxu1 %vm849_vm0, %v848_v1 }
  0x4d   :  { %666 = vmatmul.mubr.f32.gmra.mxu0 %v46_v24  ;;  %737 = vmatmul.mubr.f32.gmra.mxu1 %v46_v24 }
  0x4e   :  { %668 = vmatprep.mubr.msk.f32.mxu0 %vm849_vm0, %v848_v1  ;;  %739 = vmatprep.mubr.msk.f32.mxu1 %vm849_vm0, %v848_v1 }
  0x51   :  { %669 = vmatmul.mubr.f32.gmra.mxu0 %v47_v25  ;;  %740 = vmatmul.mubr.f32.gmra.mxu1 %v47_v25 }
  0x52   :  { %671 = vmatprep.mubr.msk.f32.mxu0 %vm849_vm0, %v848_v1  ;;  %742 = vmatprep.mubr.msk.f32.mxu1 %vm849_vm0, %v848_v1 }
  0x55   :  { %672 = vmatmul.mubr.f32.gmra.mxu0 %v48_v26  ;;  %743 = vmatmul.mubr.f32.gmra.mxu1 %v48_v26 }
  0x56   :  { %674 = vmatprep.mubr.msk.f32.mxu0 %vm849_vm0, %v848_v1  ;;  %745 = vmatprep.mubr.msk.f32.mxu1 %vm849_vm0, %v848_v1 }
  0x59   :  { %675 = vmatmul.mubr.f32.gmra.mxu0 %v49_v27  ;;  %746 = vmatmul.mubr.f32.gmra.mxu1 %v49_v27 }
  0x5a   :  { %677 = vmatprep.mubr.msk.f32.mxu0 %vm849_vm0, %v848_v1  ;;  %748 = vmatprep.mubr.msk.f32.mxu1 %vm849_vm0, %v848_v1 }
  0x5d   :  { %678 = vmatmul.mubr.f32.gmra.mxu0 %v50_v28  ;;  %749 = vmatmul.mubr.f32.gmra.mxu1 %v50_v28 }
  0x5e   :  { %680 = vmatprep.mubr.msk.f32.mxu0 %vm849_vm0, %v848_v1  ;;  %751 = vmatprep.mubr.msk.f32.mxu1 %vm849_vm0, %v848_v1 }
  0x61   :  { %681 = vmatmul.mubr.f32.gmra.mxu0 %v51_v29  ;;  %752 = vmatmul.mubr.f32.gmra.mxu1 %v51_v29 }
  0x62   :  { %683 = vmatprep.mubr.msk.f32.mxu0 %vm849_vm0, %v848_v1  ;;  %754 = vmatprep.mubr.msk.f32.mxu1 %vm849_vm0, %v848_v1 }
  0x65   :  { %684 = vmatmul.mubr.f32.gmra.mxu0 %v52_v30  ;;  %755 = vmatmul.mubr.f32.gmra.mxu1 %v52_v30 }
  0x66   :  { %686 = vmatprep.mubr.msk.f32.mxu0 %vm849_vm0, %v848_v1  ;;  %757 = vmatprep.mubr.msk.f32.mxu1 %vm849_vm0, %v848_v1 }
  0x69   :  { %687 = vmatmul.mubr.f32.gmra.mxu0 %v53_v31  ;;  %758 = vmatmul.mubr.f32.gmra.mxu1 %v53_v31 }
  0x6a   :  { %689 = vmatprep.mubr.msk.f32.mxu0 %vm849_vm0, %v848_v1  ;;  %760 = vmatprep.mubr.msk.f32.mxu1 %vm849_vm0, %v848_v1 }
  0x6d   :  { %690 = vmatmul.mubr.f32.gmra.mxu0 %v54_v32  ;;  %761 = vmatmul.mubr.f32.gmra.mxu1 %v54_v32 }
  0x6e   :  { %692 = vmatprep.mubr.msk.f32.mxu0 %vm849_vm0, %v848_v1  ;;  %763 = vmatprep.mubr.msk.f32.mxu1 %vm849_vm0, %v848_v1 }
  0x71   :  { %693 = vmatmul.mubr.f32.gmra.mxu0 %v55_v33  ;;  %764 = vmatmul.mubr.f32.gmra.mxu1 %v55_v33 }
 0x101   :  { %v243_v34 = vpop.f32.mrf.mxu0  ;;  %v373_v35 = vpop.f32.mrf.mxu1 }
 0x102   :  { %v437_v63 = vmul.f32 %v373_v35, %v243_v34 }
 0x103   :  { %v658_v36 = vpop.f32.mrf.mxu0  ;;  %v729_v37 = vpop.f32.mrf.mxu1 }
 0x105   :  { %v248_v38 = vpop.f32.mrf.mxu0  ;;  %v378_v39 = vpop.f32.mrf.mxu1 }
 0x106   :  { %v438_v60 = vmul.f32 %v378_v39, %v248_v38 }
 0x107   :  { %v661_v40 = vpop.f32.mrf.mxu0  ;;  %v732_v41 = vpop.f32.mrf.mxu1 }
 0x108   :  { %v450_v3 = vadd.f32 %v438_v60, %v437_v63 }
 0x109   :  { %v253_v42 = vpop.f32.mrf.mxu0  ;;  %v383_v43 = vpop.f32.mrf.mxu1 }
 0x10a   :  { %v439_v0 = vmul.f32 %v383_v43, %v253_v42 }
 0x10b   :  { %v664_v44 = vpop.f32.mrf.mxu0  ;;  %v735_v45 = vpop.f32.mrf.mxu1 }
 0x10c   :  { %v451_v7 = vadd.f32 %v450_v3, %v439_v0 }
 0x10d   :  { %v258_v46 = vpop.f32.mrf.mxu0  ;;  %v388_v47 = vpop.f32.mrf.mxu1 }
 0x10e   :  { %v440_v4 = vmul.f32 %v388_v47, %v258_v46 }
 0x10f   :  { %v667_v48 = vpop.f32.mrf.mxu0  ;;  %v738_v49 = vpop.f32.mrf.mxu1 }
 0x110   :  { %v452_v11 = vadd.f32 %v451_v7, %v440_v4 }
 0x111   :  { %v263_v50 = vpop.f32.mrf.mxu0  ;;  %v393_v51 = vpop.f32.mrf.mxu1 }
 0x112   :  { %v441_v8 = vmul.f32 %v393_v51, %v263_v50 }
 0x113   :  { %v670_v52 = vpop.f32.mrf.mxu0  ;;  %v741_v53 = vpop.f32.mrf.mxu1 }
 0x114   :  { %v453_v15 = vadd.f32 %v452_v11, %v441_v8 }
 0x115   :  { %v268_v54 = vpop.f32.mrf.mxu0  ;;  %v398_v55 = vpop.f32.mrf.mxu1 }
 0x116   :  { %v442_v12 = vmul.f32 %v398_v55, %v268_v54 }
 0x117   :  { %v673_v56 = vpop.f32.mrf.mxu0  ;;  %v744_v57 = vpop.f32.mrf.mxu1 }
 0x118   :  { %v454_v19 = vadd.f32 %v453_v15, %v442_v12 }
 0x119   :  { %v273_v58 = vpop.f32.mrf.mxu0  ;;  %v403_v59 = vpop.f32.mrf.mxu1 }
 0x11a   :  { %v443_v16 = vmul.f32 %v403_v59, %v273_v58 }
 0x11b   :  { %v676_v61 = vpop.f32.mrf.mxu0  ;;  %v747_v62 = vpop.f32.mrf.mxu1 }
 0x11c   :  { %v455_v23 = vadd.f32 %v454_v19, %v443_v16 }
 0x11d   :  { %v278_v1 = vpop.f32.mrf.mxu0  ;;  %v408_v2 = vpop.f32.mrf.mxu1 }
 0x11e   :  { %v444_v20 = vmul.f32 %v408_v2, %v278_v1 }
 0x11f   :  { %v679_v5 = vpop.f32.mrf.mxu0  ;;  %v750_v6 = vpop.f32.mrf.mxu1 }
 0x120   :  { %v456_v27 = vadd.f32 %v455_v23, %v444_v20 }
 0x121   :  { %v283_v9 = vpop.f32.mrf.mxu0  ;;  %v413_v10 = vpop.f32.mrf.mxu1 }
 0x122   :  { %v445_v24 = vmul.f32 %v413_v10, %v283_v9 }
 0x123   :  { %v682_v13 = vpop.f32.mrf.mxu0  ;;  %v753_v14 = vpop.f32.mrf.mxu1 }
 0x124   :  { %v457_v31 = vadd.f32 %v456_v27, %v445_v24 }
 0x125   :  { %v288_v17 = vpop.f32.mrf.mxu0  ;;  %v418_v18 = vpop.f32.mrf.mxu1 }
 0x126   :  { %v446_v28 = vmul.f32 %v418_v18, %v288_v17 }
 0x127   :  { %v685_v21 = vpop.f32.mrf.mxu0  ;;  %v756_v22 = vpop.f32.mrf.mxu1 }
 0x128   :  { %v458_v35 = vadd.f32 %v457_v31, %v446_v28 }
 0x129   :  { %v293_v25 = vpop.f32.mrf.mxu0  ;;  %v423_v26 = vpop.f32.mrf.mxu1 }
 0x12a   :  { %v447_v32 = vmul.f32 %v423_v26, %v293_v25 }
 0x12b   :  { %v688_v29 = vpop.f32.mrf.mxu0  ;;  %v759_v30 = vpop.f32.mrf.mxu1 }
 0x12c   :  { %v459_v39 = vadd.f32 %v458_v35, %v447_v32 }
 0x12d   :  { %v298_v33 = vpop.f32.mrf.mxu0  ;;  %v428_v34 = vpop.f32.mrf.mxu1 }
 0x12e   :  { %v448_v36 = vmul.f32 %v428_v34, %v298_v33 }
 0x12f   :  { %v691_v37 = vpop.f32.mrf.mxu0  ;;  %v762_v38 = vpop.f32.mrf.mxu1 }
 0x130   :  { %v460_v42 = vadd.f32 %v459_v39, %v448_v36 }
 0x131   :  { %v303_v40 = vpop.f32.mrf.mxu0  ;;  %v433_v41 = vpop.f32.mrf.mxu1 }
 0x132   :  { %v449_v43 = vmul.f32 %v433_v41, %v303_v40 }
 0x133   :  { %v694_v44 = vpop.f32.mrf.mxu0  ;;  %v765_v45 = vpop.f32.mrf.mxu1 }
 0x134   :  { %v461_v46 = vadd.f32 %v460_v42, %v449_v43 }
 0x136   :  { %v462_v47 = vrot.slane %v461_v46, 4 }
 0x138   :  { %v463_v48 = vadd.f32 %v462_v47, %v461_v46 }
 0x13a   :  { %v464_v49 = vrot.slane %v463_v48, 2 }
 0x13c   :  { %v465_v50 = vadd.f32 %v464_v49, %v463_v48 }
 0x13e   :  { %v466_v51 = vrot.slane %v465_v50, 1 }
 0x140   :  { %v467_v52 = vadd.f32 %v466_v51, %v465_v50 }
 0x142   :  { %v469_v53 = vand.u32 2147483647, %v467_v52  ;;  %v468_v0 = vmin.f32 %v467_v52, 0.0 }
 0x144   :  { %v470_v54 = vsub.f32 0.0, %v469_v53 }
 0x146   :  { %v471_v55 = vmul.f32 1.442695, %v470_v54 }
 0x148   :  { %774 = vpow2.f32 %v471_v55 }
 0x155   :  { %v775_v56 = vpop.eup %774 }
 0x156   :  { %v473_v57 = vadd.f32 1.0, %v775_v56  ;;  %v476_v58 = vmul.f32 -0.5, %v775_v56  ;;  %v479_v60 = vand.u32 2147483647, %v775_v56 }
 0x158   :  { %776 = vlog2.f32 %v473_v57  ;;  %v477_v59 = vadd.f32 1.0, %v476_v58  ;;  %vm480_vm0 = vcmp.lt.f32.partialorder %v479_v60, 0.0004427343 }
 0x15a   :  { %v478_v63 = vmul.f32 %v775_v56, %v477_v59 }
 0x165   :  { %v777_v61 = vpop.eup %776 }
 0x166   :  { %v475_v62 = vmul.f32 0.6931472, %v777_v61 }
 0x168   :  { %v481_v1 = vsel %vm480_vm0, %v478_v63, %v475_v62 }
 0x169   :  { %v482_v2 = vsub.f32 %v468_v0, %v481_v1 }
 0x16b   :  { %483 = vst [vmem:[#allocation7] sm:$0x1] %v482_v2 }
 0x16c   :  { %829 = shalt.err (!%p826_p0)
}
 0x16d   :  { %493 = dma.vmem_to_hbm [thread:$0]  %s491_s25, 16, %s1058_s3, [#allocation4]  }
 0x16e   :  { %842 = dma.done.wait [#allocation4], 16  }
 0x16f   :  { %843 = vsyncadd [#allocation4], 4294967280 }
 0x170   :  { %497 = vsyncpa [#allocation3], 1 }
 0x171   :  { %498 = vsyncpa [#allocation6], 1 }
 0x172   :  { %499 = vsyncpa [#allocation4], 1 }

</bundles_post_ra>
